<compile_context>
chip_gen: v5e
topology: v5e:2x2
jax: 0.10.0
libtpu: 0.0.40
codegen_flags: <defaults>
</compile_context>

<pallas_src>
from typing import List, Optional

import jax
import jax.numpy as jnp
from jax import lax
from jax.experimental import pallas as pl
from jax.experimental.pallas import tpu as pltpu


# --------------------------------------------------------------------------
# Pallas kernel: shared MLP (folded conv1x1 + BN + ReLU chain) + max-pool
# over the nsample axis, written directly in channels-first (cout, ts) layout.
# --------------------------------------------------------------------------
def _make_mlp_pool_kernel(num_layers: int, ts: int, ns: int):
    def kernel(*refs):
        # refs = (x_ref, w0, b0, w1, b1, ..., out_ref)
        x_ref = refs[0]
        out_ref = refs[-1]
        cin = x_ref.shape[-1]
        # (1, ts, ns, cin) -> (ts*ns, cin).  Collapsing the leading dims keeps
        # the channel (lane) axis minor, so this is layout-preserving whenever
        # nsample is a multiple of 8 (the usual case).
        h = x_ref[0].reshape(ts * ns, cin)                      # bf16

        # Hidden layers: 1x1 conv (+BN folded) + ReLU.  bf16 MXU, f32 accum.
        for l in range(num_layers - 1):
            w = refs[1 + 2 * l][...]                            # (cin_l, cout_l) bf16
            b = refs[2 + 2 * l][...]                            # (1, cout_l)   f32
            z = jnp.dot(h, w, preferred_element_type=jnp.float32)
            h = jnp.maximum(z + b, 0.0).astype(jnp.bfloat16)

        # Last layer: matmul, then max-pool over nsample BEFORE bias + ReLU
        # (bias-add and ReLU are monotone, so the max commutes) -> the final
        # elementwise work shrinks by nsample x.
        w = refs[1 + 2 * (num_layers - 1)][...]
        b = refs[2 + 2 * (num_layers - 1)][...]
        z = jnp.dot(h, w, preferred_element_type=jnp.float32)   # (ts*ns, cout)
        cout = z.shape[-1]
        pooled = jnp.max(z.reshape(ts, ns, cout), axis=1)       # (ts, cout)
        pooled = jnp.maximum(pooled + b, 0.0)
        # Write the transposed (cout, ts) tile: lane-dense stores and exactly
        # the channels-first layout the module returns (no wrapper transpose).
        out_ref[0] = pooled.T
    return kernel


def _choose_row_tile(S: int, B: int, ns: int, cin: int, cmax: int, cout: int,
                     budget_bytes: int = 16 << 20) -> int:
    """Largest row tile (in sampled points) that fits the VMEM budget."""
    # per-row VMEM: 2x double-buffered bf16 input + live f32/bf16 intermediates
    # + double-buffered f32 output column.
    row = 4 * ns * cin + 6 * ns * cmax + 8 * cout + 128
    if S % 128 == 0:
        ts = (budget_bytes // row) // 128 * 128
        ts = int(max(128, min(ts, S)))
        # keep at least two grid steps so both v7x TensorCores get work
        if B * (S // ts) < 2 and ts % 256 == 0:
            ts //= 2
        return ts
    # lane dim of the output block must be 128-aligned or full-extent
    return S


def shared_mlp_maxpool(x, weights, biases):
    """x: (B, S, ns, cin) bf16 -> (B, cout_last, S) f32 via one Pallas call."""
    B, S, ns, cin = x.shape
    cout = int(weights[-1].shape[1])
    num_layers = len(weights)
    cmax = max([int(cin)] + [int(w.shape[1]) for w in weights])

    ts = _choose_row_tile(S, B, ns, int(cin), cmax, cout)
    grid = (B, S // ts)

    in_specs = [pl.BlockSpec((1, ts, ns, cin), lambda bi, si: (bi, si, 0, 0))]
    args = [x]
    for w, b in zip(weights, biases):
        # weights / biases: full-array blocks, constant index map -> resident.
        in_specs.append(pl.BlockSpec(tuple(w.shape), lambda bi, si: (0, 0)))
        in_specs.append(pl.BlockSpec(tuple(b.shape), lambda bi, si: (0, 0)))
        args.append(w)
        args.append(b)
    out_spec = pl.BlockSpec((1, cout, ts), lambda bi, si: (bi, 0, si))

    flops = 2 * B * S * ns * sum(int(w.shape[0]) * int(w.shape[1]) for w in weights)
    bytes_accessed = (x.size * x.dtype.itemsize
                      + sum(int(w.size) * w.dtype.itemsize for w in weights)
                      + sum(int(b.size) * b.dtype.itemsize for b in biases)
                      + B * cout * S * 4)

    return pl.pallas_call(
        _make_mlp_pool_kernel(num_layers, ts, ns),
        out_shape=jax.ShapeDtypeStruct((B, cout, S), jnp.float32),
        grid=grid,
        in_specs=in_specs,
        out_specs=out_spec,
        compiler_params=pltpu.CompilerParams(
            dimension_semantics=("parallel", "parallel"),
            vmem_limit_bytes=32 * 1024 * 1024),
        cost_estimate=pl.CostEstimate(
            flops=int(flops), transcendentals=0,
            bytes_accessed=int(bytes_accessed)),
    )(*args)


# --------------------------------------------------------------------------
# Plain-JAX glue: FPS, gather, ball query (sequential / data-dependent)
# --------------------------------------------------------------------------
def furthest_point_sample(xyz, npoint: int):
    """xyz: (B, N, 3) -> (B, npoint) int32, same semantics as the CUDA FPS."""
    N = xyz.shape[1]

    def single(pts):
        def body(i, state):
            idxs, dists, last = state
            idxs = idxs.at[i].set(last)
            d = jnp.sum((pts - pts[last]) ** 2, axis=-1)
            dists = jnp.minimum(dists, d)
            nxt = jnp.argmax(dists).astype(jnp.int32)
            return idxs, dists, nxt

        idxs0 = jnp.zeros((npoint,), jnp.int32)
        dists0 = jnp.full((N,), 1e10, jnp.float32)
        idxs, _, _ = lax.fori_loop(0, npoint, body, (idxs0, dists0, jnp.int32(0)))
        return idxs

    return jax.vmap(single)(xyz)


def gather_points(pts, idx):
    """pts: (B, N, D), idx: (B, ...) int -> (B, ..., D)."""
    return jax.vmap(lambda p, i: p[i])(pts, idx)


def ball_query(radius: float, nsample: int, xyz, new_xyz):
    """xyz: (B,N,3), new_xyz: (B,S,3) -> (B,S,nsample) int32.
    Matches the CUDA ball_query: first points (in index order) within radius;
    missing slots filled with the first found index (0 if none)."""
    N = xyz.shape[1]
    d2 = jnp.sum((new_xyz[:, :, None, :] - xyz[:, None, :, :]) ** 2, axis=-1)
    mask = d2 < (radius * radius)
    arange = jnp.arange(N, dtype=jnp.int32)[None, None, :]
    key = jnp.where(mask, arange, jnp.int32(N))
    # smallest nsample keys == first nsample in-radius indices; top_k of the
    # negated keys avoids a full O(N log N) sort over the point axis.
    neg_top, _ = lax.top_k(-key, nsample)
    skey = -neg_top                                   # ascending
    first = skey[:, :, :1]
    first = jnp.where(first < N, first, 0)
    idx = jnp.where(skey < N, skey, first)
    return idx.astype(jnp.int32)


# --------------------------------------------------------------------------
# Module
# --------------------------------------------------------------------------
class PointnetSAModuleMSGVotesPallas:
    def __init__(self, *, mlps: List[List[int]], npoint: int,
                 radii: List[float], nsamples: List[int],
                 bn: bool = True, use_xyz: bool = True, key=None):
        assert len(mlps) == len(nsamples) == len(radii)
        self.npoint = npoint
        self.radii = list(radii)
        self.nsamples = list(nsamples)
        self.use_xyz = use_xyz
        if key is None:
            key = jax.random.PRNGKey(0)

        eps = 1e-5
        # BN folded in eval mode with default running stats:
        #   gamma=1, beta=0, running_mean=0, running_var=1
        bn_scale = 1.0 / jnp.sqrt(1.0 + eps) if bn else 1.0
        self.params = []  # per scale: list of (W_eff (cin,cout) bf16, b_eff (1,cout) f32)
        for spec in mlps:
            spec = list(spec)
            if use_xyz:
                spec[0] += 3
            layers = []
            for l in range(len(spec) - 1):
                cin, cout = spec[l], spec[l + 1]
                key, sub = jax.random.split(key)
                w = jax.random.normal(sub, (cin, cout), jnp.float32) * 0.1
                w_eff = (w * bn_scale).astype(jnp.bfloat16)
                b_eff = jnp.zeros((1, cout), jnp.float32)
                layers.append((w_eff, b_eff))
            self.params.append(layers)

    def __call__(self, xyz, features: Optional[jnp.ndarray] = None,
                 inds: Optional[jnp.ndarray] = None):
        """
        xyz:      (B, N, 3) f32
        features: (B, C, N) f32 or None
        inds:     (B, npoint) int32 or None
        returns:  new_xyz (B, npoint, 3), new_features (B, sum_cout, npoint),
                  inds (B, npoint)
        """
        B, N, _ = xyz.shape
        if inds is None:
            inds = furthest_point_sample(xyz, self.npoint)
        new_xyz = gather_points(xyz, inds)                      # (B, S, 3)

        feats_last = None
        if features is not None:
            feats_last = jnp.transpose(features, (0, 2, 1))      # (B, N, C)

        S = self.npoint
        outs = []
        for i in range(len(self.radii)):
            radius, ns = self.radii[i], self.nsamples[i]
            idx = ball_query(radius, ns, xyz, new_xyz)           # (B, S, ns)

            grouped_xyz = gather_points(xyz, idx) - new_xyz[:, :, None, :]
            pieces = []
            if self.use_xyz:
                pieces.append(grouped_xyz)                       # (B, S, ns, 3)
            if feats_last is not None:
                pieces.append(gather_points(feats_last, idx))    # (B, S, ns, C)
            grouped = jnp.concatenate(pieces, axis=-1)           # (B, S, ns, Cin)
            # TODO(synk): gather inside the Pallas pipeline (scalar-prefetch
            # idx + manual DMA) instead of materializing `grouped` in HBM.
            grouped = grouped.astype(jnp.bfloat16)

            weights = [p[0] for p in self.params[i]]
            biases = [p[1] for p in self.params[i]]
            outs.append(shared_mlp_maxpool(grouped, weights, biases))  # (B, cout, S)

        new_features = jnp.concatenate(outs, axis=1)             # (B, sum_cout, S)
        return new_xyz, new_features, inds


# --------------------------------------------------------------------------
# Demo
# --------------------------------------------------------------------------
if __name__ == "__main__":
    key = jax.random.PRNGKey(0)
    k_xyz, k_feat, k_param = jax.random.split(key, 3)

    B, N, C = 2, 64, 4
    npoint = 16
    radii = [0.2, 0.4]
    nsamples = [8, 16]
    mlps = [[C, 16, 16, 32], [C, 16, 16, 32]]   # use_xyz adds +3 to mlp[0]

    xyz = jax.random.uniform(k_xyz, (B, N, 3), jnp.float32)
    features = jax.random.normal(k_feat, (B, C, N), jnp.float32)

    module = PointnetSAModuleMSGVotesPallas(
        mlps=mlps, npoint=npoint, radii=radii, nsamples=nsamples,
        bn=True, use_xyz=True, key=k_param)

    new_xyz, new_features, inds = module(xyz, features)
    jax.block_until_ready((new_xyz, new_features, inds))

    assert new_xyz.shape == (B, npoint, 3), new_xyz.shape
    assert new_features.shape == (B, 32 + 32, npoint), new_features.shape
    assert inds.shape == (B, npoint), inds.shape
    assert new_features.dtype == jnp.float32
    assert bool(jnp.all(jnp.isfinite(new_features)))

    print("KERNEL_OK")
</pallas_src>

<mosaic_0001>
module attributes {stable_mosaic.version = 11 : i64} {
  func.func @kernel(%arg0: i32, %arg1: i32, %arg2: memref<1x16x8x7xbf16, #tpu.memory_space<vmem>>, %arg3: memref<7x16xbf16, #tpu.memory_space<vmem>>, %arg4: memref<1x16xf32, #tpu.memory_space<vmem>>, %arg5: memref<16x16xbf16, #tpu.memory_space<vmem>>, %arg6: memref<1x16xf32, #tpu.memory_space<vmem>>, %arg7: memref<16x32xbf16, #tpu.memory_space<vmem>>, %arg8: memref<1x32xf32, #tpu.memory_space<vmem>>, %arg9: memref<1x32x16xf32, #tpu.memory_space<vmem>>) attributes {dimension_semantics = [#tpu.dimension_semantics<parallel>, #tpu.dimension_semantics<parallel>], iteration_bounds = array<i64: 2, 1>, scalar_prefetch = 0 : i64, scratch_operands = 0 : i64, tpu.core_type = #tpu.core_type<tc>, window_params = [{transform_indices = @transform_0, window_bounds = array<i64: 1, 16, 8, 7>}, {pipeline_mode = #tpu.pipeline_mode<synchronous>, transform_indices = @transform_1, window_bounds = array<i64: 7, 16>}, {pipeline_mode = #tpu.pipeline_mode<synchronous>, transform_indices = @transform_2, window_bounds = array<i64: 1, 16>}, {pipeline_mode = #tpu.pipeline_mode<synchronous>, transform_indices = @transform_3, window_bounds = array<i64: 16, 16>}, {pipeline_mode = #tpu.pipeline_mode<synchronous>, transform_indices = @transform_4, window_bounds = array<i64: 1, 16>}, {pipeline_mode = #tpu.pipeline_mode<synchronous>, transform_indices = @transform_5, window_bounds = array<i64: 16, 32>}, {pipeline_mode = #tpu.pipeline_mode<synchronous>, transform_indices = @transform_6, window_bounds = array<i64: 1, 32>}, {transform_indices = @transform_7, window_bounds = array<i64: 1, 32, 16>}]} {
    %c0 = arith.constant 0 : index
    %c0_0 = arith.constant 0 : index
    %c0_1 = arith.constant 0 : index
    %c0_2 = arith.constant 0 : index
    %0 = vector.load %arg2[%c0, %c0_0, %c0_1, %c0_2] : memref<1x16x8x7xbf16, #tpu.memory_space<vmem>>, vector<1x16x8x7xbf16>
    %1 = vector.shape_cast %0 : vector<1x16x8x7xbf16> to vector<16x8x7xbf16>
    %2 = vector.shape_cast %1 : vector<16x8x7xbf16> to vector<128x7xbf16>
    %c0_3 = arith.constant 0 : index
    %c0_4 = arith.constant 0 : index
    %3 = vector.load %arg3[%c0_3, %c0_4] : memref<7x16xbf16, #tpu.memory_space<vmem>>, vector<7x16xbf16>
    %c0_5 = arith.constant 0 : index
    %c0_6 = arith.constant 0 : index
    %4 = vector.load %arg4[%c0_5, %c0_6] : memref<1x16xf32, #tpu.memory_space<vmem>>, vector<1x16xf32>
    %cst = arith.constant dense<0.000000e+00> : vector<128x16xf32>
    %5 = tpu.matmul %2, %3, %cst {dimension_numbers = #tpu.dot_dimension_numbers<[1], [0], [0], [1], [0, 0, 1, 1], [], []>} : vector<128x7xbf16>, vector<7x16xbf16>, vector<128x16xf32> -> vector<128x16xf32>
    %6 = vector.broadcast %4 : vector<1x16xf32> to vector<128x16xf32>
    %7 = arith.addf %5, %6 : vector<128x16xf32>
    %cst_7 = arith.constant 0.000000e+00 : f32
    %8 = vector.broadcast %cst_7 : f32 to vector<128x16xf32>
    %9 = arith.maximumf %7, %8 : vector<128x16xf32>
    %10 = arith.truncf %9 : vector<128x16xf32> to vector<128x16xbf16>
    %c0_8 = arith.constant 0 : index
    %c0_9 = arith.constant 0 : index
    %11 = vector.load %arg5[%c0_8, %c0_9] : memref<16x16xbf16, #tpu.memory_space<vmem>>, vector<16x16xbf16>
    %c0_10 = arith.constant 0 : index
    %c0_11 = arith.constant 0 : index
    %12 = vector.load %arg6[%c0_10, %c0_11] : memref<1x16xf32, #tpu.memory_space<vmem>>, vector<1x16xf32>
    %cst_12 = arith.constant dense<0.000000e+00> : vector<128x16xf32>
    %13 = tpu.matmul %10, %11, %cst_12 {dimension_numbers = #tpu.dot_dimension_numbers<[1], [0], [0], [1], [0, 0, 1, 1], [], []>} : vector<128x16xbf16>, vector<16x16xbf16>, vector<128x16xf32> -> vector<128x16xf32>
    %14 = vector.broadcast %12 : vector<1x16xf32> to vector<128x16xf32>
    %15 = arith.addf %13, %14 : vector<128x16xf32>
    %cst_13 = arith.constant 0.000000e+00 : f32
    %16 = vector.broadcast %cst_13 : f32 to vector<128x16xf32>
    %17 = arith.maximumf %15, %16 : vector<128x16xf32>
    %18 = arith.truncf %17 : vector<128x16xf32> to vector<128x16xbf16>
    %c0_14 = arith.constant 0 : index
    %c0_15 = arith.constant 0 : index
    %19 = vector.load %arg7[%c0_14, %c0_15] : memref<16x32xbf16, #tpu.memory_space<vmem>>, vector<16x32xbf16>
    %c0_16 = arith.constant 0 : index
    %c0_17 = arith.constant 0 : index
    %20 = vector.load %arg8[%c0_16, %c0_17] : memref<1x32xf32, #tpu.memory_space<vmem>>, vector<1x32xf32>
    %cst_18 = arith.constant dense<0.000000e+00> : vector<128x32xf32>
    %21 = tpu.matmul %18, %19, %cst_18 {dimension_numbers = #tpu.dot_dimension_numbers<[1], [0], [0], [1], [0, 0, 1, 1], [], []>} : vector<128x16xbf16>, vector<16x32xbf16>, vector<128x32xf32> -> vector<128x32xf32>
    %22 = vector.shape_cast %21 : vector<128x32xf32> to vector<16x8x32xf32>
    %cst_19 = arith.constant dense<0xFF800000> : vector<16x32xf32>
    %23 = vector.multi_reduction <maximumf>, %22, %cst_19 [1] : vector<16x8x32xf32> to vector<16x32xf32>
    %24 = vector.broadcast %20 : vector<1x32xf32> to vector<16x32xf32>
    %25 = arith.addf %23, %24 : vector<16x32xf32>
    %cst_20 = arith.constant 0.000000e+00 : f32
    %26 = vector.broadcast %cst_20 : f32 to vector<16x32xf32>
    %27 = arith.maximumf %25, %26 : vector<16x32xf32>
    %28 = tpu.transpose %27, [1, 0] : vector<16x32xf32> -> vector<32x16xf32>
    %c0_21 = arith.constant 0 : index
    %c0_22 = arith.constant 0 : index
    %c0_23 = arith.constant 0 : index
    %29 = vector.load %arg9[%c0_21, %c0_22, %c0_23] : memref<1x32x16xf32, #tpu.memory_space<vmem>>, vector<1x32x16xf32>
    %30 = vector.shape_cast %29 : vector<1x32x16xf32> to vector<32x16xf32>
    %31 = vector.shape_cast %28 : vector<32x16xf32> to vector<1x32x16xf32>
    tpu.vector_store %arg9[%c0_21, %c0_22, %c0_23], %31 {strides = array<i32>} : memref<1x32x16xf32, #tpu.memory_space<vmem>>, vector<1x32x16xf32>,
    return
  }
  func.func @transform_0(%arg0: i32, %arg1: i32) -> (i32, i32, i32, i32) {
    %c0_i32 = arith.constant 0 : i32
    %c0_i32_0 = arith.constant 0 : i32
    %c0_i32_1 = arith.constant 0 : i32
    return %arg0, %arg1, %c0_i32, %c0_i32_0 : i32, i32, i32, i32
  }
  func.func @transform_1(%arg0: i32, %arg1: i32) -> (i32, i32) {
    %c0_i32 = arith.constant 0 : i32
    %c0_i32_0 = arith.constant 0 : i32
    %c0_i32_1 = arith.constant 0 : i32
    return %c0_i32, %c0_i32_0 : i32, i32
  }
  func.func @transform_2(%arg0: i32, %arg1: i32) -> (i32, i32) {
    %c0_i32 = arith.constant 0 : i32
    %c0_i32_0 = arith.constant 0 : i32
    %c0_i32_1 = arith.constant 0 : i32
    return %c0_i32, %c0_i32_0 : i32, i32
  }
  func.func @transform_3(%arg0: i32, %arg1: i32) -> (i32, i32) {
    %c0_i32 = arith.constant 0 : i32
    %c0_i32_0 = arith.constant 0 : i32
    %c0_i32_1 = arith.constant 0 : i32
    return %c0_i32, %c0_i32_0 : i32, i32
  }
  func.func @transform_4(%arg0: i32, %arg1: i32) -> (i32, i32) {
    %c0_i32 = arith.constant 0 : i32
    %c0_i32_0 = arith.constant 0 : i32
    %c0_i32_1 = arith.constant 0 : i32
    return %c0_i32, %c0_i32_0 : i32, i32
  }
  func.func @transform_5(%arg0: i32, %arg1: i32) -> (i32, i32) {
    %c0_i32 = arith.constant 0 : i32
    %c0_i32_0 = arith.constant 0 : i32
    %c0_i32_1 = arith.constant 0 : i32
    return %c0_i32, %c0_i32_0 : i32, i32
  }
  func.func @transform_6(%arg0: i32, %arg1: i32) -> (i32, i32) {
    %c0_i32 = arith.constant 0 : i32
    %c0_i32_0 = arith.constant 0 : i32
    %c0_i32_1 = arith.constant 0 : i32
    return %c0_i32, %c0_i32_0 : i32, i32
  }
  func.func @transform_7(%arg0: i32, %arg1: i32) -> (i32, i32, i32) {
    %c0_i32 = arith.constant 0 : i32
    %c0_i32_0 = arith.constant 0 : i32
    return %arg0, %c0_i32, %arg1 : i32, i32, i32
  }
}

</mosaic_0001>

<bundles_post_ra>
// kernel: tpu_custom_call.1
= control target key start
LH: loop header
LB: loop body
LE: loop exit
PB: predicated region body
PF: predicated region fallthrough
CT: control target
= control target key end

     0   :  { %s1178_s24 = smov 0   ;;  %s1180_s25 = smov 0   ;;  %s1312_s0 = inlined_call_operand.vmem [shape: bf16[2,16,8,7], index: 0, kind: input, shape index: {}]   ;;  %s1313_s1 = inlined_call_operand.vmem [shape: bf16[7,16], index: 1, kind: input, shape index: {}]   ;;  %s1314_s2 = inlined_call_operand.vmem [shape: f32[1,16], index: 2, kind: input, shape index: {}]   ;;  %s1315_s3 = inlined_call_operand.vmem [shape: bf16[16,16], index: 3, kind: input, shape index: {}]   ;;  %s1316_s4 = inlined_call_operand.vmem [shape: f32[1,16], index: 4, kind: input, shape index: {}]   ;;  %s1317_s5 = inlined_call_operand.vmem [shape: bf16[16,32], index: 5, kind: input, shape index: {}]   ;;  %s1318_s6 = inlined_call_operand.vmem [shape: f32[1,32], index: 6, kind: input, shape index: {}]   ;;  %s1319_s7 = inlined_call_operand.vmem [shape: f32[2,32,16], index: 7, kind: output, shape index: {}]  }
   0x1   :  { %s1182_s26 = smov 0  }
   0x2 LB: > { %s29_s27 = sadd.s32 1, %s1131_s25  ;;  %p998_p0 = scmp.ge.s32.totalorder %s1135_s26, 1  ;;  %s1135_s26 = sphi %s1182_s26, %s17_s26   ;;  %s1131_s25 = sphi %s1180_s25, %s1321_s25   ;;  %s1127_s24 = sphi %s1178_s24, %s1320_s24  }
   0x3   : > { %p31_p1 = scmp.ge.s32.totalorder %s29_s27, 2  ;;  %p258_p2 = scmp.lt.s32.totalorder %s1135_s26, 3 }
   0x5   : > { %s1323_s27 = smov (%p31_p1, %s29_s27), 0  ;;  %p259_p3 = pnand %p998_p0, %p258_p2 }
   0x6   : > { %p298_p4 = scmp.lt.s32.totalorder (!%p259_p3), %s1127_s24, 1 }
   0x7   : > { %262 = sbr.rel (%p259_p3) target bundleno = 726 (0x2d6), region = 48 }
   0xc   : > { %v332_v0 = vld [vmem:[%s1313_s1] sm:$0xf]  ;;  %vm402_vm0 = vcmask 1042432   ;;  %vm403_vm1 = vcmask 1043456   ;;  %v1137_v1 = vmov 65535   ;;  %s1325_s24 = smov (!%p298_p4, %s1127_s24), 1 }
   0xd   : > { %v404_v2 = vsel %vm402_vm0, 4294967295, %v1137_v1  ;;  %s1069_s30 = sshll.u32 %s1325_s24, 6  ;;  %vm377_vm2 = vcmask 56320   ;;  %v1079_v13 = vld [vmem:[%s1315_s3] sm:$0xff]  ;;  %vm494_vm3 = vcmask 130048   ;;  %vm674_vm4 = vcmask 261120  }
   0xe   : > { %v405_v3 = vsel %vm403_vm1, %v404_v2, 0  ;;  %s305_s10 = scalar_lea.vmem %s1312_s0, %s1069_s30  ;;  %526 = vmatpush.bf16.msra.mxu1 %v1079_v13  ;;  %v1110_v15 = vld [vmem:[%s1314_s2] ss:$0 sm:$0xff]  ;;  %vm839_vm5 = vcmask 1041409   ;;  %vm842_vm6 = vcmask 1042434   ;;  %vm845_vm7 = vcmask 1043459  }
   0xf   : > { %v407_v4 = vand.u32 %v405_v3, %v332_v0  ;;  %v1071_v5 = vld [vmem:[%s305_s10] sm:$0xff]  ;;  %v1077_v6 = vld [vmem:[%s305_s10 + $0x30] sm:$0xff]  ;;  %v1072_v7 = vld [vmem:[%s305_s10 + $0x8] sm:$0xff]  ;;  %vm848_vm8 = vcmask 1044484   ;;  %vm851_vm9 = vcmask 1045509   ;;  %vm854_vm10 = vcmask 1046534  }
  0x10   : > { %v1078_v8 = vld [vmem:[%s305_s10 + $0x38] sm:$0xff]  ;;  %v1073_v9 = vld [vmem:[%s305_s10 + $0x10] sm:$0xff]  ;;  %v1075_v11 = vld [vmem:[%s305_s10 + $0x20] sm:$0xff]  ;;  %vm857_vm11 = vcmask 1047559   ;;  %s1070_s21 = sshll.u32 %s1325_s24, 5 }
  0x11   : > { %416 = vmatpush.bf16.msra.mxu0 %v407_v4  ;;  %1081 = vmatpush.bf16.msra.mxu3 %v407_v4  ;;  %v1074_v10 = vld [vmem:[%s305_s10 + $0x18] sm:$0xff]  ;;  %v1076_v12 = vld [vmem:[%s305_s10 + $0x28] sm:$0xff]  ;;  %s314_s28 = scalar_lea.vmem %s1319_s7, %s1070_s21 }
  0x14   : > { %1035 = vmatmul.msk.bf16.vlgmr.msra.gmra.mxu0 %vm377_vm2, %v1071_v5  ;;  %1041 = vmatmul.msk.bf16.vlgmr.msra.gmra.mxu3 %vm377_vm2, %v1077_v6 }
  0x15   : > { %1082 = vmatpush.bf16.msrb.mxu3 %v1079_v13 }
  0x24   : > { %1036 = vmatmul.msk.bf16.gmra.mxu0 %vm377_vm2, %v1072_v7  ;;  %1042 = vmatmul.msk.bf16.gmra.mxu3 %vm377_vm2, %v1078_v8  ;;  %v1080_v7 = vld [vmem:[%s1317_s5] sm:$0xff] }
  0x25   : > { %632 = vmatpush.bf16.msra.mxu2 %v1080_v7  ;;  %1083 = vmatpush.bf16.msra.mxu3 %v1080_v7 }
  0x34   : > { %1037 = vmatmul.msk.bf16.gmra.mxu0 %vm377_vm2, %v1073_v9  ;;  %v1111_v9 = vld [vmem:[%s1316_s4] ss:$0 sm:$0xff] }
  0x44   : > { %1038 = vmatmul.msk.bf16.gmra.mxu0 %vm377_vm2, %v1074_v10 }
  0x54   : > { %1039 = vmatmul.msk.bf16.gmra.mxu0 %vm377_vm2, %v1075_v11 }
  0x64   : > { %1040 = vmatmul.msk.bf16.gmra.mxu0 %vm377_vm2, %v1076_v12 }
  0x91   : > { %v418_v14 = vpop.f32.mrf.mxu0 }
  0x92   : > { %v419_v17 = vadd.f32 %v1110_v15, %v418_v14 }
  0x94   : > { %v458_v20 = vmax.f32 %v419_v17, 0.0 }
  0x97   : > { %v448_v16 = vpop.f32.mrf.mxu3 }
  0x98   : > { %v449_v22 = vadd.f32 %v1110_v15, %v448_v16 }
  0x99   : > { %v420_v18 = vpop.f32.mrf.mxu0 }
  0x9a   : > { %v421_v19 = vadd.f32 %v1110_v15, %v420_v18  ;;  %v470_v25 = vmax.f32 %v449_v22, 0.0 }
  0x9c   : > { %v459_v21 = vmax.f32 %v421_v19, 0.0 }
  0x9e   : > { %v474_v23 = vpack.c.bf16 %v459_v21, %v458_v20 }
  0x9f   : > { %v450_v24 = vpop.f32.mrf.mxu3 }
  0xa0   : > { %1047 = vmatmul.msk.bf16.vlgmr.msra.gmra.mxu1 %vm494_vm3, %v474_v23  ;;  %v451_v26 = vadd.f32 %v1110_v15, %v450_v24 }
  0xa1   : > { %v423_v27 = vpop.f32.mrf.mxu0 }
  0xa2   : > { %v471_v28 = vmax.f32 %v451_v26, 0.0  ;;  %v424_v31 = vadd.f32 %v1110_v15, %v423_v27 }
  0xa4   : > { %v480_v29 = vpack.c.bf16 %v471_v28, %v470_v25  ;;  %v460_v34 = vmax.f32 %v424_v31, 0.0 }
  0xa6   : > { %1053 = vmatmul.msk.bf16.vlgmr.msrb.gmra.mxu3 %vm494_vm3, %v480_v29 }
  0xa7   : > { %v453_v30 = vpop.f32.mrf.mxu3 }
  0xa8   : > { %v454_v36 = vadd.f32 %v1110_v15, %v453_v30 }
  0xa9   : > { %v425_v32 = vpop.f32.mrf.mxu0 }
  0xaa   : > { %v426_v33 = vadd.f32 %v1110_v15, %v425_v32  ;;  %v472_v39 = vmax.f32 %v454_v36, 0.0 }
  0xac   : > { %v461_v35 = vmax.f32 %v426_v33, 0.0 }
  0xae   : > { %v475_v37 = vpack.c.bf16 %v461_v35, %v460_v34 }
  0xaf   : > { %v455_v38 = vpop.f32.mrf.mxu3 }
  0xb0   : > { %1048 = vmatmul.msk.bf16.gmra.mxu1 %vm494_vm3, %v475_v37  ;;  %v456_v40 = vadd.f32 %v1110_v15, %v455_v38 }
  0xb1   : > { %v428_v41 = vpop.f32.mrf.mxu0 }
  0xb2   : > { %v473_v42 = vmax.f32 %v456_v40, 0.0  ;;  %v429_v44 = vadd.f32 %v1110_v15, %v428_v41 }
  0xb4   : > { %v481_v43 = vpack.c.bf16 %v473_v42, %v472_v39  ;;  %v462_v47 = vmax.f32 %v429_v44, 0.0 }
  0xb6   : > { %1054 = vmatmul.msk.bf16.gmra.mxu3 %vm494_vm3, %v481_v43 }
  0xb9   : > { %v430_v45 = vpop.f32.mrf.mxu0 }
  0xba   : > { %v431_v46 = vadd.f32 %v1110_v15, %v430_v45 }
  0xbc   : > { %v463_v48 = vmax.f32 %v431_v46, 0.0 }
  0xbe   : > { %v476_v49 = vpack.c.bf16 %v463_v48, %v462_v47 }
  0xc0   : > { %1049 = vmatmul.msk.bf16.gmra.mxu1 %vm494_vm3, %v476_v49 }
  0xc1   : > { %v433_v50 = vpop.f32.mrf.mxu0 }
  0xc2   : > { %v434_v51 = vadd.f32 %v1110_v15, %v433_v50 }
  0xc4   : > { %v464_v54 = vmax.f32 %v434_v51, 0.0 }
  0xc9   : > { %v435_v52 = vpop.f32.mrf.mxu0 }
  0xca   : > { %v436_v53 = vadd.f32 %v1110_v15, %v435_v52 }
  0xcc   : > { %v465_v55 = vmax.f32 %v436_v53, 0.0 }
  0xce   : > { %v477_v56 = vpack.c.bf16 %v465_v55, %v464_v54 }
  0xd0   : > { %1050 = vmatmul.msk.bf16.gmra.mxu1 %vm494_vm3, %v477_v56 }
  0xd1   : > { %v438_v57 = vpop.f32.mrf.mxu0 }
  0xd2   : > { %v439_v58 = vadd.f32 %v1110_v15, %v438_v57 }
  0xd4   : > { %v466_v61 = vmax.f32 %v439_v58, 0.0 }
  0xd9   : > { %v440_v59 = vpop.f32.mrf.mxu0 }
  0xda   : > { %v441_v60 = vadd.f32 %v1110_v15, %v440_v59 }
  0xdc   : > { %v467_v62 = vmax.f32 %v441_v60, 0.0 }
  0xde   : > { %v478_v63 = vpack.c.bf16 %v467_v62, %v466_v61 }
  0xe0   : > { %1051 = vmatmul.msk.bf16.gmra.mxu1 %vm494_vm3, %v478_v63 }
  0xe1   : > { %v443_v0 = vpop.f32.mrf.mxu0 }
  0xe2   : > { %v444_v1 = vadd.f32 %v1110_v15, %v443_v0 }
  0xe4   : > { %v468_v4 = vmax.f32 %v444_v1, 0.0 }
  0xe9   : > { %v445_v2 = vpop.f32.mrf.mxu0 }
  0xea   : > { %v446_v3 = vadd.f32 %v1110_v15, %v445_v2 }
  0xec   : > { %v469_v5 = vmax.f32 %v446_v3, 0.0 }
  0xee   : > { %v479_v6 = vpack.c.bf16 %v469_v5, %v468_v4 }
  0xf0   : > { %1052 = vmatmul.msk.bf16.gmra.mxu1 %vm494_vm3, %v479_v6 }
 0x11d   : > { %v528_v8 = vpop.f32.mrf.mxu1 }
 0x11e   : > { %v529_v10 = vadd.f32 %v1111_v9, %v528_v8 }
 0x120   : > { %v568_v13 = vmax.f32 %v529_v10, 0.0 }
 0x125   : > { %v530_v11 = vpop.f32.mrf.mxu1 }
 0x126   : > { %v531_v12 = vadd.f32 %v1111_v9, %v530_v11 }
 0x128   : > { %v569_v14 = vmax.f32 %v531_v12, 0.0 }
 0x129   : > { %v558_v15 = vpop.f32.mrf.mxu3 }
 0x12a   : > { %v584_v16 = vpack.c.bf16 %v569_v14, %v568_v13  ;;  %v559_v18 = vadd.f32 %v1111_v9, %v558_v15 }
 0x12c   : > { %1059 = vmatmul.msk.bf16.vlgmr.msra.gmra.mxu2 %vm494_vm3, %v584_v16  ;;  %v580_v20 = vmax.f32 %v559_v18, 0.0 }
 0x12d   : > { %v533_v17 = vpop.f32.mrf.mxu1 }
 0x12e   : > { %v534_v22 = vadd.f32 %v1111_v9, %v533_v17 }
 0x130   : > { %v570_v27 = vmax.f32 %v534_v22, 0.0 }
 0x131   : > { %v560_v19 = vpop.f32.mrf.mxu3 }
 0x132   : > { %v561_v21 = vadd.f32 %v1111_v9, %v560_v19 }
 0x134   : > { %v581_v23 = vmax.f32 %v561_v21, 0.0 }
 0x135   : > { %v535_v24 = vpop.f32.mrf.mxu1 }
 0x136   : > { %v536_v25 = vadd.f32 %v1111_v9, %v535_v24  ;;  %v590_v26 = vpack.c.bf16 %v581_v23, %v580_v20 }
 0x138   : > { %v571_v28 = vmax.f32 %v536_v25, 0.0  ;;  %1065 = vmatmul.msk.bf16.vlgmr.msra.gmra.mxu3 %vm494_vm3, %v590_v26 }
 0x139   : > { %v563_v29 = vpop.f32.mrf.mxu3 }
 0x13a   : > { %v585_v30 = vpack.c.bf16 %v571_v28, %v570_v27  ;;  %v564_v32 = vadd.f32 %v1111_v9, %v563_v29 }
 0x13c   : > { %1060 = vmatmul.msk.bf16.gmra.mxu2 %vm494_vm3, %v585_v30  ;;  %v582_v34 = vmax.f32 %v564_v32, 0.0 }
 0x13d   : > { %v538_v31 = vpop.f32.mrf.mxu1 }
 0x13e   : > { %v539_v36 = vadd.f32 %v1111_v9, %v538_v31 }
 0x140   : > { %v572_v41 = vmax.f32 %v539_v36, 0.0 }
 0x141   : > { %v565_v33 = vpop.f32.mrf.mxu3 }
 0x142   : > { %v566_v35 = vadd.f32 %v1111_v9, %v565_v33 }
 0x144   : > { %v583_v37 = vmax.f32 %v566_v35, 0.0 }
 0x145   : > { %v540_v38 = vpop.f32.mrf.mxu1 }
 0x146   : > { %v541_v39 = vadd.f32 %v1111_v9, %v540_v38  ;;  %v591_v40 = vpack.c.bf16 %v583_v37, %v582_v34 }
 0x148   : > { %v573_v42 = vmax.f32 %v541_v39, 0.0  ;;  %1066 = vmatmul.msk.bf16.gmra.mxu3 %vm494_vm3, %v591_v40 }
 0x14a   : > { %v586_v43 = vpack.c.bf16 %v573_v42, %v572_v41 }
 0x14c   : > { %1061 = vmatmul.msk.bf16.gmra.mxu2 %vm494_vm3, %v586_v43 }
 0x14d   : > { %v543_v44 = vpop.f32.mrf.mxu1 }
 0x14e   : > { %v544_v45 = vadd.f32 %v1111_v9, %v543_v44 }
 0x150   : > { %v574_v48 = vmax.f32 %v544_v45, 0.0 }
 0x155   : > { %v545_v46 = vpop.f32.mrf.mxu1 }
 0x156   : > { %v546_v47 = vadd.f32 %v1111_v9, %v545_v46 }
 0x158   : > { %v575_v49 = vmax.f32 %v546_v47, 0.0 }
 0x15a   : > { %v587_v50 = vpack.c.bf16 %v575_v49, %v574_v48 }
 0x15c   : > { %1062 = vmatmul.msk.bf16.gmra.mxu2 %vm494_vm3, %v587_v50 }
 0x15d   : > { %v548_v51 = vpop.f32.mrf.mxu1 }
 0x15e   : > { %v549_v52 = vadd.f32 %v1111_v9, %v548_v51 }
 0x160   : > { %v576_v55 = vmax.f32 %v549_v52, 0.0  ;;  %v1253_v52 = vld [vmem:[%s1318_s6] ss:$0 sm:$0xff] }
 0x165   : > { %v550_v53 = vpop.f32.mrf.mxu1 }
 0x166   : > { %v551_v54 = vadd.f32 %v1111_v9, %v550_v53 }
 0x168   : > { %v577_v56 = vmax.f32 %v551_v54, 0.0 }
 0x16a   : > { %v588_v57 = vpack.c.bf16 %v577_v56, %v576_v55 }
 0x16c   : > { %1063 = vmatmul.msk.bf16.gmra.mxu2 %vm494_vm3, %v588_v57 }
 0x16d   : > { %v553_v58 = vpop.f32.mrf.mxu1 }
 0x16e   : > { %v554_v59 = vadd.f32 %v1111_v9, %v553_v58 }
 0x170   : > { %v578_v62 = vmax.f32 %v554_v59, 0.0 }
 0x175   : > { %v555_v60 = vpop.f32.mrf.mxu1 }
 0x176   : > { %v556_v61 = vadd.f32 %v1111_v9, %v555_v60 }
 0x178   : > { %v579_v63 = vmax.f32 %v556_v61, 0.0 }
 0x17a   : > { %v589_v0 = vpack.c.bf16 %v579_v63, %v578_v62 }
 0x17c   : > { %1064 = vmatmul.msk.bf16.gmra.mxu2 %vm494_vm3, %v589_v0 }
 0x1af   : > { %v634_v1 = vpop.f32.mrf.mxu2 }
 0x1b0   : > { %v675_v13 = vsel %vm674_vm4, %v634_v1, -inf }
 0x1b1   : > { %v676_v17 = vrot.slane %v675_v13, 4 }
 0x1b3   : > { %v677_v26 = vmax.f32 %v675_v13, %v676_v17 }
 0x1b5   : > { %v678_v33 = vrot.slane %v677_v26, 2 }
 0x1b7   : > { %v636_v2 = vpop.f32.mrf.mxu2  ;;  %v679_v42 = vmax.f32 %v677_v26, %v678_v33 }
 0x1b8   : > { %v682_v5 = vsel %vm674_vm4, %v636_v2, -inf }
 0x1b9   : > { %v683_v10 = vrot.slane %v682_v5, 4  ;;  %v680_v51 = vrot.slane %v679_v42, 1 }
 0x1bb   : > { %v684_v15 = vmax.f32 %v682_v5, %v683_v10  ;;  %v1247_v23 = vpop.f32.mrf.mxu3  ;;  %v681_v63 = vmax.f32 %v679_v42, %v680_v51 }
 0x1bd   : > { %v685_v22 = vrot.slane %v684_v15, 2 }
 0x1bf   : > { %v639_v3 = vpop.f32.mrf.mxu2  ;;  %v686_v30 = vmax.f32 %v684_v15, %v685_v22 }
 0x1c0   : > { %v689_v6 = vsel %vm674_vm4, %v639_v3, -inf }
 0x1c1   : > { %v690_v11 = vrot.slane %v689_v6, 4  ;;  %v687_v38 = vrot.slane %v686_v30, 1 }
 0x1c3   : > { %v691_v16 = vmax.f32 %v689_v6, %v690_v11  ;;  %v666_v44 = vpop.f32.mrf.mxu3  ;;  %v688_v47 = vmax.f32 %v686_v30, %v687_v38 }
 0x1c5   : > { %v692_v25 = vrot.slane %v691_v16, 2  ;;  %v791_v58 = vadd.f32 %v1253_v52, %v688_v47 }
 0x1c7   : > { %v641_v4 = vpop.f32.mrf.mxu2  ;;  %v693_v32 = vmax.f32 %v691_v16, %v692_v25 }
 0x1c8   : > { %v696_v8 = vsel %vm674_vm4, %v641_v4, -inf  ;;  %v807_v4 = vmax.f32 %v791_v58, 0.0 }
 0x1c9   : > { %v697_v12 = vrot.slane %v696_v8, 4  ;;  %v694_v41 = vrot.slane %v693_v32, 1 }
 0x1ca   : > { %v838_v15 = vrot.slane %v807_v4, 7 }
 0x1cb   : > { %v698_v18 = vmax.f32 %v696_v8, %v697_v12  ;;  %v695_v50 = vmax.f32 %v693_v32, %v694_v41  ;;  %v669_v6 = vpop.f32.mrf.mxu3 }
 0x1cd   : > { %v699_v27 = vrot.slane %v698_v18, 2  ;;  %v792_v62 = vadd.f32 %v1253_v52, %v695_v50 }
 0x1cf   : > { %v644_v7 = vpop.f32.mrf.mxu2  ;;  %v700_v34 = vmax.f32 %v698_v18, %v699_v27  ;;  %v808_v8 = vmax.f32 %v792_v62, 0.0 }
 0x1d0   : > { %v703_v9 = vsel %vm674_vm4, %v644_v7, -inf }
 0x1d1   : > { %v704_v14 = vrot.slane %v703_v9, 4  ;;  %v701_v43 = vrot.slane %v700_v34, 1  ;;  %v841_v18 = vrot.slane %v808_v8, 6 }
 0x1d3   : > { %v705_v20 = vmax.f32 %v703_v9, %v704_v14  ;;  %v702_v53 = vmax.f32 %v700_v34, %v701_v43  ;;  %v790_v9 = vadd.f32 %v1253_v52, %v681_v63  ;;  %v671_v32 = vpop.f32.mrf.mxu3 }
 0x1d4   : > { %v780_v43 = vsel %vm674_vm4, %v671_v32, -inf }
 0x1d5   : > { %v706_v29 = vrot.slane %v705_v20, 2  ;;  %v793_v0 = vadd.f32 %v1253_v52, %v702_v53  ;;  %v781_v50 = vrot.slane %v780_v43, 4 }
 0x1d7   : > { %v646_v19 = vpop.f32.mrf.mxu2  ;;  %v707_v36 = vmax.f32 %v705_v20, %v706_v29  ;;  %v809_v11 = vmax.f32 %v793_v0, 0.0  ;;  %v806_v20 = vmax.f32 %v790_v9, 0.0 }
 0x1d8   : > { %v710_v21 = vsel %vm674_vm4, %v646_v19, -inf }
 0x1d9   : > { %v711_v24 = vrot.slane %v710_v21, 4  ;;  %v708_v46 = vrot.slane %v707_v36, 1  ;;  %v840_v25 = vsel %vm839_vm5, %v838_v15, %v806_v20 }
 0x1da   : > { %v843_v29 = vsel %vm842_vm6, %v841_v18, %v840_v25 }
 0x1db   : > { %v712_v28 = vmax.f32 %v710_v21, %v711_v24  ;;  %v709_v56 = vmax.f32 %v707_v36, %v708_v46  ;;  %v844_v21 = vrot.slane %v809_v11, 5 }
 0x1dd   : > { %v713_v31 = vrot.slane %v712_v28, 2  ;;  %v794_v3 = vadd.f32 %v1253_v52, %v709_v56 }
 0x1df   : > { %v649_v35 = vpop.f32.mrf.mxu2  ;;  %v714_v39 = vmax.f32 %v712_v28, %v713_v31  ;;  %v810_v14 = vmax.f32 %v794_v3, 0.0  ;;  %v759_v28 = vsel %vm674_vm4, %v1247_v23, -inf  ;;  %v766_v31 = vsel %vm674_vm4, %v666_v44, -inf }
 0x1e0   : > { %v717_v37 = vsel %vm674_vm4, %v649_v35, -inf  ;;  %v846_v35 = vsel %vm845_vm7, %v844_v21, %v843_v29  ;;  %v773_v23 = vsel %vm674_vm4, %v669_v6, -inf  ;;  %v760_v42 = vrot.slane %v759_v28, 4 }
 0x1e1   : > { %v718_v40 = vrot.slane %v717_v37, 4  ;;  %v715_v48 = vrot.slane %v714_v39, 1  ;;  %v847_v24 = vrot.slane %v810_v14, 4 }
 0x1e2   : > { %v761_v53 = vmax.f32 %v759_v28, %v760_v42 }
 0x1e3   : > { %v719_v45 = vmax.f32 %v717_v37, %v718_v40  ;;  %v716_v59 = vmax.f32 %v714_v39, %v715_v48  ;;  %v849_v38 = vsel %vm848_vm8, %v847_v24, %v846_v35 }
 0x1e4   : > { %v762_v62 = vrot.slane %v761_v53, 2 }
 0x1e5   : > { %v720_v49 = vrot.slane %v719_v45, 2  ;;  %v795_v5 = vadd.f32 %v1253_v52, %v716_v59  ;;  %v782_v59 = vmax.f32 %v780_v43, %v781_v50 }
 0x1e6   : > { %v763_v6 = vmax.f32 %v761_v53, %v762_v62 }
 0x1e7   : > { %v721_v54 = vmax.f32 %v719_v45, %v720_v49  ;;  %v651_v55 = vpop.f32.mrf.mxu2  ;;  %v811_v16 = vmax.f32 %v795_v5, 0.0  ;;  %v767_v45 = vrot.slane %v766_v31, 4  ;;  %v774_v49 = vrot.slane %v773_v23, 4 }
 0x1e8   : > { %v724_v57 = vsel %vm674_vm4, %v651_v55, -inf  ;;  %v783_v3 = vrot.slane %v782_v59, 2 }
 0x1e9   : > { %v722_v60 = vrot.slane %v721_v54, 1  ;;  %v725_v61 = vrot.slane %v724_v57, 4  ;;  %v850_v26 = vrot.slane %v811_v16, 3 }
 0x1eb   : > { %v723_v1 = vmax.f32 %v721_v54, %v722_v60  ;;  %v726_v2 = vmax.f32 %v724_v57, %v725_v61  ;;  %v852_v40 = vsel %vm851_vm9, %v850_v26, %v849_v38  ;;  %v768_v54 = vmax.f32 %v766_v31, %v767_v45 }
 0x1ec   : > { %v775_v57 = vmax.f32 %v773_v23, %v774_v49 }
 0x1ed   : > { %v727_v7 = vrot.slane %v726_v2, 2  ;;  %v796_v10 = vadd.f32 %v1253_v52, %v723_v1  ;;  %v769_v63 = vrot.slane %v768_v54, 2 }
 0x1ef   : > { %v728_v12 = vmax.f32 %v726_v2, %v727_v7  ;;  %v654_v13 = vpop.f32.mrf.mxu2  ;;  %v812_v19 = vmax.f32 %v796_v10, 0.0  ;;  %v776_v2 = vrot.slane %v775_v57, 2  ;;  %v770_v7 = vmax.f32 %v768_v54, %v769_v63 }
 0x1f0   : > { %v731_v36 = vsel %vm674_vm4, %v654_v13, -inf  ;;  %v784_v13 = vmax.f32 %v782_v59, %v783_v3 }
 0x1f1   : > { %v729_v17 = vrot.slane %v728_v12, 1  ;;  %v853_v30 = vrot.slane %v812_v19, 2  ;;  %v732_v46 = vrot.slane %v731_v36, 4  ;;  %v777_v11 = vmax.f32 %v775_v57, %v776_v2 }
 0x1f2   : > { %v771_v18 = vrot.slane %v770_v7, 1  ;;  %v785_v24 = vrot.slane %v784_v13, 1 }
 0x1f3   : > { %v730_v22 = vmax.f32 %v728_v12, %v729_v17  ;;  %v855_v44 = vsel %vm854_vm10, %v853_v30, %v852_v40  ;;  %v733_v55 = vmax.f32 %v731_v36, %v732_v46  ;;  %v764_v17 = vrot.slane %v763_v6, 1 }
 0x1f4   : > { %v772_v29 = vmax.f32 %v770_v7, %v771_v18 }
 0x1f5   : > { %v797_v27 = vadd.f32 %v1253_v52, %v730_v22  ;;  %v734_v0 = vrot.slane %v733_v55, 2  ;;  %v778_v22 = vrot.slane %v777_v11, 1 }
 0x1f6   : > { %v803_v38 = vadd.f32 %v1253_v52, %v772_v29 }
 0x1f7   : > { %v656_v33 = vpop.f32.mrf.mxu2  ;;  %v813_v34 = vmax.f32 %v797_v27, 0.0  ;;  %v735_v8 = vmax.f32 %v733_v55, %v734_v0  ;;  %v765_v27 = vmax.f32 %v763_v6, %v764_v17  ;;  %v779_v32 = vmax.f32 %v777_v11, %v778_v22 }
 0x1f8   : > { %v738_v37 = vsel %vm674_vm4, %v656_v33, -inf  ;;  %v786_v33 = vmax.f32 %v784_v13, %v785_v24  ;;  %v819_v46 = vmax.f32 %v803_v38, 0.0 }
 0x1f9   : > { %v739_v39 = vrot.slane %v738_v37, 4  ;;  %v856_v41 = vrot.slane %v813_v34, 1  ;;  %v736_v19 = vrot.slane %v735_v8, 1  ;;  %v802_v36 = vadd.f32 %v1253_v52, %v765_v27 }
 0x1fa   : > { %v804_v40 = vadd.f32 %v1253_v52, %v779_v32  ;;  %v805_v43 = vadd.f32 %v1253_v52, %v786_v33 }
 0x1fb   : > { %v740_v47 = vmax.f32 %v738_v37, %v739_v39  ;;  %v858_v48 = vsel %vm857_vm11, %v856_v41, %v855_v44  ;;  %v737_v30 = vmax.f32 %v735_v8, %v736_v19  ;;  %v818_v44 = vmax.f32 %v802_v36, 0.0 }
 0x1fc   : > { %875 = vxpose.xlu0.b32.start [1/2] (short) (narrow) %v858_v48, 32  ;;  %v820_v49 = vmax.f32 %v804_v40, 0.0  ;;  %v821_v53 = vmax.f32 %v805_v43, 0.0 }
 0x1fd   : > { %v741_v51 = vrot.slane %v740_v47, 2  ;;  %v798_v23 = vadd.f32 %v1253_v52, %v737_v30  ;;  %v865_v54 = vrot.slane %v818_v44, 4 }
 0x1ff   : > { %v659_v56 = vpop.f32.mrf.mxu2  ;;  %v742_v60 = vmax.f32 %v740_v47, %v741_v51  ;;  %v814_v47 = vmax.f32 %v798_v23, 0.0 }
 0x200   : > { %v745_v58 = vsel %vm674_vm4, %v659_v56, -inf  ;;  %v867_v56 = vrot.slane %v819_v46, 3 }
 0x201   : > { %v746_v61 = vrot.slane %v745_v58, 4  ;;  %v743_v4 = vrot.slane %v742_v60, 1 }
 0x203   : > { %v747_v1 = vmax.f32 %v745_v58, %v746_v61  ;;  %v744_v14 = vmax.f32 %v742_v60, %v743_v4  ;;  %v871_v60 = vrot.slane %v821_v53, 1 }
 0x205   : > { %v748_v5 = vrot.slane %v747_v1, 2  ;;  %v799_v25 = vadd.f32 %v1253_v52, %v744_v14 }
 0x207   : > { %v749_v10 = vmax.f32 %v747_v1, %v748_v5  ;;  %v661_v9 = vpop.f32.mrf.mxu2  ;;  %v815_v34 = vmax.f32 %v799_v25, 0.0 }
 0x208   : > { %v752_v12 = vsel %vm674_vm4, %v661_v9, -inf }
 0x209   : > { %v750_v15 = vrot.slane %v749_v10, 1  ;;  %v753_v16 = vrot.slane %v752_v12, 4  ;;  %v859_v41 = vrot.slane %v815_v34, 7 }
 0x20b   : > { %v751_v20 = vmax.f32 %v749_v10, %v750_v15  ;;  %v754_v21 = vmax.f32 %v752_v12, %v753_v16  ;;  %v860_v50 = vsel %vm839_vm5, %v859_v41, %v814_v47 }
 0x20d   : > { %v755_v26 = vrot.slane %v754_v21, 2  ;;  %v800_v28 = vadd.f32 %v1253_v52, %v751_v20 }
 0x20f   : > { %v756_v31 = vmax.f32 %v754_v21, %v755_v26  ;;  %v816_v37 = vmax.f32 %v800_v28, 0.0 }
 0x211   : > { %v757_v35 = vrot.slane %v756_v31, 1  ;;  %v861_v45 = vrot.slane %v816_v37, 6 }
 0x213   : > { %v758_v39 = vmax.f32 %v756_v31, %v757_v35  ;;  %v862_v55 = vsel %vm842_vm6, %v861_v45, %v860_v50 }
 0x215   : > { %v801_v42 = vadd.f32 %v1253_v52, %v758_v39  ;;  %v869_v52 = vrot.slane %v820_v49, 2 }
 0x217   : > { %v817_v48 = vmax.f32 %v801_v42, 0.0 }
 0x219   : > { %v863_v51 = vrot.slane %v817_v48, 5 }
 0x21b   : > { %v864_v57 = vsel %vm845_vm7, %v863_v51, %v862_v55 }
 0x21c   : > { %v866_v58 = vsel %vm848_vm8, %v865_v54, %v864_v57 }
 0x21d   : > { %v868_v59 = vsel %vm851_vm9, %v867_v56, %v866_v58 }
 0x21e   : > { %v870_v61 = vsel %vm854_vm10, %v869_v52, %v868_v59 }
 0x21f   : > { %v872_v62 = vsel %vm857_vm11, %v871_v60, %v870_v61 }
 0x220   : > { %876 = vxpose.xlu0.b32.end [2/2] (short) (narrow) %v872_v62, 32 }
 0x2bc   : > { %v891_v63 = vpop.trf.xlu0 }
 0x2bd   : > { %907 = vst.msk [vmem:[%s314_s28] sm:$0xff] %vm494_vm3, %v891_v63 }
 0x2c4   : > { %v892_v0 = vpop.trf.xlu0 }
 0x2c5   : > { %908 = vst.msk [vmem:[%s314_s28 + $0x8] sm:$0xff] %vm494_vm3, %v892_v0 }
 0x2cc   : > { %v893_v1 = vpop.trf.xlu0 }
 0x2cd   : > { %909 = vst.msk [vmem:[%s314_s28 + $0x10] sm:$0xff] %vm494_vm3, %v893_v1 }
 0x2d4   : > { %v894_v2 = vpop.trf.xlu0 }
 0x2d5   : > { %910 = vst.msk [vmem:[%s314_s28 + $0x18] sm:$0xff] %vm494_vm3, %v894_v2 }
 0x2d6 PF: > { %s17_s26 = sadd.s32 1, %s1135_s26   ;;  %s1320_s24 = smov %s1131_s25 }
 0x2d7   : > { %p14_p5 = scmp.ge.s32.totalorder %s17_s26, 4   ;;  %s1321_s25 = smov %s1323_s27 }
 0x2d9   :  { %16 = sbr.rel (!%p14_p5) target bundleno = 2 (0x2), region = 78 }

</bundles_post_ra>
